<compile_context>
chip_gen: v5e
topology: v5e:2x2
jax: 0.10.0
libtpu: 0.0.40
codegen_flags: <defaults>
</compile_context>

<pallas_src>
import functools

import jax
import jax.numpy as jnp
import numpy as np
from jax.experimental import pallas as pl
from jax.experimental.pallas import tpu as pltpu

EPS = 1e-5
LANE = 128
SUBLANE = 8
NEG_BIG = -1e30  # drives padded bottleneck lanes to exp()==0 in the softmax


def _round_up(n, m):
    return ((n + m - 1) // m) * m


# -----------------------------------------------------------------------------
# Kernel
# -----------------------------------------------------------------------------
def autoencoder_kernel(x_ref, w_ref, v_ref, out_ref, *, row_offsets, layer_dims):
    def matmul(h, layer):
        off = row_offsets[layer]
        rin, rout = layer_dims[layer]
        # static, 8-row-aligned slice of the weight slab -> no copy
        return jnp.dot(h, w_ref[off:off + rin, 0:rout],
                       preferred_element_type=jnp.float32)

    def bn(h, row):
        # training-mode BatchNorm1d folded to a single scale/shift.
        # Two-pass stats (mu, then centered var) deliberately match the
        # reference formula: one-pass E[h^2]-mu^2 cancellation would be
        # amplified by the small-batch BN chain.
        n = h.shape[1]
        gamma = v_ref[row:row + 1, 0:n]
        beta = v_ref[row + 1:row + 2, 0:n]
        mu = jnp.mean(h, axis=0, keepdims=True)
        var = jnp.mean((h - mu) * (h - mu), axis=0, keepdims=True)
        scale = jax.lax.rsqrt(var + EPS) * gamma
        shift = beta - mu * scale
        return h * scale + shift

    h = x_ref[...]                                   # (B, input_size) f32

    # ---------------- Encoder ----------------
    h = jnp.maximum(bn(matmul(h, 0), 0), 0.0)        # (B, 256)
    h = jnp.maximum(bn(matmul(h, 1), 2), 0.0)        # (B, 128)
    h = bn(matmul(h, 2), 4)                          # (B, dh), padded lanes == -1e30

    # softmax over dim=1 -- padded lanes were already pushed to -1e30 by the
    # packed beta, so no iota/where mask is needed and exp() zeroes them.
    m = jnp.max(h, axis=1, keepdims=True)
    e = jnp.exp(h - m)
    h = e / jnp.sum(e, axis=1, keepdims=True)        # exact normalization

    # ---------------- Decoder ----------------
    h = jnp.maximum(bn(matmul(h, 3), 6), 0.0)        # (B, 128)
    h = jnp.maximum(bn(matmul(h, 4), 8), 0.0)        # (B, 256)
    h = matmul(h, 5)                                 # (B, input_size)
    h = h + v_ref[10:11, 0:h.shape[1]]               # only surviving bias (db3)

    out_ref[...] = h.astype(out_ref.dtype)


# -----------------------------------------------------------------------------
# Wrapper
# -----------------------------------------------------------------------------
def autoencoder_forward(x, w_slab, v_slab, meta):
    B, input_size = x.shape
    dims = meta["layer_dims"]
    assert dims[0][0] == input_size and dims[-1][1] == input_size

    kernel = functools.partial(
        autoencoder_kernel,
        row_offsets=meta["row_offsets"],
        layer_dims=dims,
    )

    flops = 2 * B * sum(r * c for r, c in dims)
    bytes_accessed = 4 * (x.size + B * input_size + w_slab.size + v_slab.size)
    transcendentals = B * meta["dh"] + sum(c for _, c in dims[:-1])

    vmem = pl.BlockSpec(memory_space=pltpu.MemorySpace.VMEM)
    return pl.pallas_call(
        kernel,
        out_shape=jax.ShapeDtypeStruct((B, input_size), jnp.float32),
        in_specs=[vmem, vmem, vmem],
        out_specs=vmem,
        compiler_params=pltpu.CompilerParams(
            vmem_limit_bytes=32 * 1024 * 1024),
        cost_estimate=pl.CostEstimate(
            flops=flops,
            transcendentals=transcendentals,
            bytes_accessed=bytes_accessed),
    )(x.astype(jnp.float32), w_slab, v_slab)


# -----------------------------------------------------------------------------
# Parameter init (PyTorch-style) and packing into two lane-dense slabs
# -----------------------------------------------------------------------------
def init_params(key, input_size, hidden_size):
    """Deterministic PyTorch-style init. Linear weights stored as (in, out)."""
    def linear(key, fan_in, fan_out):
        kw, kb = jax.random.split(key)
        bound = 1.0 / np.sqrt(fan_in)
        w = jax.random.uniform(kw, (fan_in, fan_out), jnp.float32, -bound, bound)
        b = jax.random.uniform(kb, (1, fan_out), jnp.float32, -bound, bound)
        return w, b

    def bn(n):
        return jnp.ones((1, n), jnp.float32), jnp.zeros((1, n), jnp.float32)

    keys = jax.random.split(key, 6)
    ew1, eb1 = linear(keys[0], input_size, 256)
    eg1, ebt1 = bn(256)
    ew2, eb2 = linear(keys[1], 256, 128)
    eg2, ebt2 = bn(128)
    ew3, eb3 = linear(keys[2], 128, hidden_size)
    eg3, ebt3 = bn(hidden_size)
    dw1, db1 = linear(keys[3], hidden_size, 128)
    dg1, dbt1 = bn(128)
    dw2, db2 = linear(keys[4], 128, 256)
    dg2, dbt2 = bn(256)
    dw3, db3 = linear(keys[5], 256, input_size)
    return [
        ew1, eb1, eg1, ebt1,
        ew2, eb2, eg2, ebt2,
        ew3, eb3, eg3, ebt3,
        dw1, db1, dg1, dbt1,
        dw2, db2, dg2, dbt2,
        dw3, db3,
    ]


def pack_params(params, input_size, hidden_size):
    """Pack into one weight slab + one vector slab (lane-dense, 8-row aligned).

    * Biases of Linears followed by BatchNorm are dropped (exactly cancelled
      by the batch-mean subtraction); only the final bias db3 is kept.
    * Invariant for the bottleneck BN (rows 4/5 of the vector slab): gamma is
      exactly 0 and beta is -1e30 in padded lanes [hidden_size:dh], so the
      kernel's softmax sees exp(-1e30)=0 there with NO in-kernel mask.  Do not
      break this when changing the packing.
    """
    (ew1, _eb1, eg1, ebt1, ew2, _eb2, eg2, ebt2, ew3, _eb3, eg3, ebt3,
     dw1, _db1, dg1, dbt1, dw2, _db2, dg2, dbt2, dw3, db3) = params

    dh = _round_up(hidden_size, LANE)
    width = max(256, dh, _round_up(input_size, LANE))

    layer_dims = [(input_size, 256), (256, 128), (128, dh),
                  (dh, 128), (128, 256), (256, input_size)]
    weights = [ew1, ew2, ew3, dw1, dw2, dw3]

    row_offsets = []
    total_rows = 0
    for (r, _) in layer_dims:
        row_offsets.append(total_rows)
        total_rows += _round_up(r, SUBLANE)     # keep every offset 8-aligned
    total_rows = _round_up(total_rows, SUBLANE)

    w_slab = np.zeros((total_rows, width), np.float32)
    for w, off in zip(weights, row_offsets):
        wn = np.asarray(w, np.float32)
        w_slab[off:off + wn.shape[0], :wn.shape[1]] = wn

    vec_list = [eg1, ebt1, eg2, ebt2, eg3, ebt3, dg1, dbt1, dg2, dbt2, db3]
    v_slab = np.zeros((_round_up(len(vec_list), SUBLANE), width), np.float32)
    for i, v in enumerate(vec_list):
        vn = np.asarray(v, np.float32).reshape(-1)
        v_slab[i, :vn.shape[0]] = vn
    if dh > hidden_size:
        # bottleneck beta (row 5): padded lanes -> -1e30 (see invariant above)
        v_slab[5, hidden_size:dh] = NEG_BIG

    meta = dict(dh=dh,
                row_offsets=tuple(row_offsets),
                layer_dims=tuple(layer_dims))
    return jnp.asarray(w_slab), jnp.asarray(v_slab), meta


# -----------------------------------------------------------------------------
# Pure-JAX reference (uses the original, unpacked, biased parameters)
# -----------------------------------------------------------------------------
def reference_forward(x, params):
    (ew1, eb1, eg1, ebt1, ew2, eb2, eg2, ebt2, ew3, eb3, eg3, ebt3,
     dw1, db1, dg1, dbt1, dw2, db2, dg2, dbt2, dw3, db3) = params

    def bn(h, g, b):
        mu = jnp.mean(h, axis=0, keepdims=True)
        var = jnp.mean((h - mu) ** 2, axis=0, keepdims=True)
        return (h - mu) / jnp.sqrt(var + EPS) * g + b

    h = x @ ew1 + eb1
    h = jax.nn.relu(bn(h, eg1, ebt1))
    h = h @ ew2 + eb2
    h = jax.nn.relu(bn(h, eg2, ebt2))
    h = h @ ew3 + eb3
    h = bn(h, eg3, ebt3)
    h = jax.nn.softmax(h, axis=1)
    h = h @ dw1 + db1
    h = jax.nn.relu(bn(h, dg1, dbt1))
    h = h @ dw2 + db2
    h = jax.nn.relu(bn(h, dg2, dbt2))
    h = h @ dw3 + db3
    return h


if __name__ == "__main__":
    batch = 8
    input_size = 64
    hidden_size = 32

    key = jax.random.PRNGKey(0)
    kx, kp = jax.random.split(key)
    x = jax.random.normal(kx, (batch, input_size), jnp.float32)

    params = init_params(kp, input_size, hidden_size)
    w_slab, v_slab, meta = pack_params(params, input_size, hidden_size)

    out = jax.block_until_ready(autoencoder_forward(x, w_slab, v_slab, meta))
    ref = jax.block_until_ready(reference_forward(x, params))

    assert out.shape == (batch, input_size)
    np.testing.assert_allclose(np.asarray(out), np.asarray(ref),
                               rtol=2e-3, atol=2e-3)

    print("KERNEL_OK")
</pallas_src>

<mosaic_0001>
module attributes {stable_mosaic.version = 11 : i64} {
  func.func @autoencoder_kernel(%arg0: memref<8x64xf32, #tpu.memory_space<vmem>>, %arg1: memref<960x256xf32, #tpu.memory_space<vmem>>, %arg2: memref<16x256xf32, #tpu.memory_space<vmem>>, %arg3: memref<8x64xf32, #tpu.memory_space<vmem>>) attributes {dimension_semantics = [], scalar_prefetch = 0 : i64, scratch_operands = 0 : i64, tpu.core_type = #tpu.core_type<tc>} {
    %c0 = arith.constant 0 : index
    %c0_0 = arith.constant 0 : index
    %0 = vector.load %arg0[%c0, %c0_0] : memref<8x64xf32, #tpu.memory_space<vmem>>, vector<8x64xf32>
    %c0_1 = arith.constant 0 : index
    %c0_2 = arith.constant 0 : index
    %1 = vector.load %arg1[%c0_1, %c0_2] : memref<960x256xf32, #tpu.memory_space<vmem>>, vector<64x256xf32>
    %cst = arith.constant dense<0.000000e+00> : vector<8x256xf32>
    %2 = tpu.matmul %0, %1, %cst {dimension_numbers = #tpu.dot_dimension_numbers<[1], [0], [0], [1], [0, 0, 1, 1], [], []>} : vector<8x64xf32>, vector<64x256xf32>, vector<8x256xf32> -> vector<8x256xf32>
    %c0_3 = arith.constant 0 : index
    %c0_4 = arith.constant 0 : index
    %3 = vector.load %arg2[%c0_3, %c0_4] : memref<16x256xf32, #tpu.memory_space<vmem>>, vector<1x256xf32>
    %c1 = arith.constant 1 : index
    %c0_5 = arith.constant 0 : index
    %4 = vector.load %arg2[%c1, %c0_5] : memref<16x256xf32, #tpu.memory_space<vmem>>, vector<1x256xf32>
    %cst_6 = arith.constant dense<0.000000e+00> : vector<256xf32>
    %5 = vector.multi_reduction <add>, %2, %cst_6 [0] : vector<8x256xf32> to vector<256xf32>
    %6 = vector.shape_cast %5 : vector<256xf32> to vector<1x256xf32>
    %cst_7 = arith.constant 8.000000e+00 : f32
    %7 = vector.broadcast %cst_7 : f32 to vector<1x256xf32>
    %8 = arith.divf %6, %7 : vector<1x256xf32>
    %9 = vector.broadcast %8 : vector<1x256xf32> to vector<8x256xf32>
    %10 = arith.subf %2, %9 : vector<8x256xf32>
    %11 = vector.broadcast %8 : vector<1x256xf32> to vector<8x256xf32>
    %12 = arith.subf %2, %11 : vector<8x256xf32>
    %13 = arith.mulf %10, %12 : vector<8x256xf32>
    %cst_8 = arith.constant dense<0.000000e+00> : vector<256xf32>
    %14 = vector.multi_reduction <add>, %13, %cst_8 [0] : vector<8x256xf32> to vector<256xf32>
    %15 = vector.shape_cast %14 : vector<256xf32> to vector<1x256xf32>
    %cst_9 = arith.constant 8.000000e+00 : f32
    %16 = vector.broadcast %cst_9 : f32 to vector<1x256xf32>
    %17 = arith.divf %15, %16 : vector<1x256xf32>
    %cst_10 = arith.constant 9.99999974E-6 : f32
    %18 = vector.broadcast %cst_10 : f32 to vector<1x256xf32>
    %19 = arith.addf %17, %18 : vector<1x256xf32>
    %20 = math.rsqrt %19 : vector<1x256xf32>
    %21 = arith.mulf %20, %3 : vector<1x256xf32>
    %22 = arith.mulf %8, %21 : vector<1x256xf32>
    %23 = arith.subf %4, %22 : vector<1x256xf32>
    %24 = vector.broadcast %21 : vector<1x256xf32> to vector<8x256xf32>
    %25 = arith.mulf %2, %24 : vector<8x256xf32>
    %26 = vector.broadcast %23 : vector<1x256xf32> to vector<8x256xf32>
    %27 = arith.addf %25, %26 : vector<8x256xf32>
    %cst_11 = arith.constant 0.000000e+00 : f32
    %28 = vector.broadcast %cst_11 : f32 to vector<8x256xf32>
    %29 = arith.maximumf %27, %28 : vector<8x256xf32>
    %c64 = arith.constant 64 : index
    %c0_12 = arith.constant 0 : index
    %30 = vector.load %arg1[%c64, %c0_12] : memref<960x256xf32, #tpu.memory_space<vmem>>, vector<256x128xf32>
    %cst_13 = arith.constant dense<0.000000e+00> : vector<8x128xf32>
    %31 = tpu.matmul %29, %30, %cst_13 {dimension_numbers = #tpu.dot_dimension_numbers<[1], [0], [0], [1], [0, 0, 1, 1], [], []>} : vector<8x256xf32>, vector<256x128xf32>, vector<8x128xf32> -> vector<8x128xf32>
    %c2 = arith.constant 2 : index
    %c0_14 = arith.constant 0 : index
    %32 = vector.load %arg2[%c2, %c0_14] : memref<16x256xf32, #tpu.memory_space<vmem>>, vector<1x128xf32>
    %c3 = arith.constant 3 : index
    %c0_15 = arith.constant 0 : index
    %33 = vector.load %arg2[%c3, %c0_15] : memref<16x256xf32, #tpu.memory_space<vmem>>, vector<1x128xf32>
    %cst_16 = arith.constant dense<0.000000e+00> : vector<128xf32>
    %34 = vector.multi_reduction <add>, %31, %cst_16 [0] : vector<8x128xf32> to vector<128xf32>
    %35 = vector.shape_cast %34 : vector<128xf32> to vector<1x128xf32>
    %cst_17 = arith.constant 8.000000e+00 : f32
    %36 = vector.broadcast %cst_17 : f32 to vector<1x128xf32>
    %37 = arith.divf %35, %36 : vector<1x128xf32>
    %38 = vector.broadcast %37 : vector<1x128xf32> to vector<8x128xf32>
    %39 = arith.subf %31, %38 : vector<8x128xf32>
    %40 = vector.broadcast %37 : vector<1x128xf32> to vector<8x128xf32>
    %41 = arith.subf %31, %40 : vector<8x128xf32>
    %42 = arith.mulf %39, %41 : vector<8x128xf32>
    %cst_18 = arith.constant dense<0.000000e+00> : vector<128xf32>
    %43 = vector.multi_reduction <add>, %42, %cst_18 [0] : vector<8x128xf32> to vector<128xf32>
    %44 = vector.shape_cast %43 : vector<128xf32> to vector<1x128xf32>
    %cst_19 = arith.constant 8.000000e+00 : f32
    %45 = vector.broadcast %cst_19 : f32 to vector<1x128xf32>
    %46 = arith.divf %44, %45 : vector<1x128xf32>
    %cst_20 = arith.constant 9.99999974E-6 : f32
    %47 = vector.broadcast %cst_20 : f32 to vector<1x128xf32>
    %48 = arith.addf %46, %47 : vector<1x128xf32>
    %49 = math.rsqrt %48 : vector<1x128xf32>
    %50 = arith.mulf %49, %32 : vector<1x128xf32>
    %51 = arith.mulf %37, %50 : vector<1x128xf32>
    %52 = arith.subf %33, %51 : vector<1x128xf32>
    %53 = vector.broadcast %50 : vector<1x128xf32> to vector<8x128xf32>
    %54 = arith.mulf %31, %53 : vector<8x128xf32>
    %55 = vector.broadcast %52 : vector<1x128xf32> to vector<8x128xf32>
    %56 = arith.addf %54, %55 : vector<8x128xf32>
    %cst_21 = arith.constant 0.000000e+00 : f32
    %57 = vector.broadcast %cst_21 : f32 to vector<8x128xf32>
    %58 = arith.maximumf %56, %57 : vector<8x128xf32>
    %c320 = arith.constant 320 : index
    %c0_22 = arith.constant 0 : index
    %59 = vector.load %arg1[%c320, %c0_22] : memref<960x256xf32, #tpu.memory_space<vmem>>, vector<128x128xf32>
    %cst_23 = arith.constant dense<0.000000e+00> : vector<8x128xf32>
    %60 = tpu.matmul %58, %59, %cst_23 {dimension_numbers = #tpu.dot_dimension_numbers<[1], [0], [0], [1], [0, 0, 1, 1], [], []>} : vector<8x128xf32>, vector<128x128xf32>, vector<8x128xf32> -> vector<8x128xf32>
    %c4 = arith.constant 4 : index
    %c0_24 = arith.constant 0 : index
    %61 = vector.load %arg2[%c4, %c0_24] : memref<16x256xf32, #tpu.memory_space<vmem>>, vector<1x128xf32>
    %c5 = arith.constant 5 : index
    %c0_25 = arith.constant 0 : index
    %62 = vector.load %arg2[%c5, %c0_25] : memref<16x256xf32, #tpu.memory_space<vmem>>, vector<1x128xf32>
    %cst_26 = arith.constant dense<0.000000e+00> : vector<128xf32>
    %63 = vector.multi_reduction <add>, %60, %cst_26 [0] : vector<8x128xf32> to vector<128xf32>
    %64 = vector.shape_cast %63 : vector<128xf32> to vector<1x128xf32>
    %cst_27 = arith.constant 8.000000e+00 : f32
    %65 = vector.broadcast %cst_27 : f32 to vector<1x128xf32>
    %66 = arith.divf %64, %65 : vector<1x128xf32>
    %67 = vector.broadcast %66 : vector<1x128xf32> to vector<8x128xf32>
    %68 = arith.subf %60, %67 : vector<8x128xf32>
    %69 = vector.broadcast %66 : vector<1x128xf32> to vector<8x128xf32>
    %70 = arith.subf %60, %69 : vector<8x128xf32>
    %71 = arith.mulf %68, %70 : vector<8x128xf32>
    %cst_28 = arith.constant dense<0.000000e+00> : vector<128xf32>
    %72 = vector.multi_reduction <add>, %71, %cst_28 [0] : vector<8x128xf32> to vector<128xf32>
    %73 = vector.shape_cast %72 : vector<128xf32> to vector<1x128xf32>
    %cst_29 = arith.constant 8.000000e+00 : f32
    %74 = vector.broadcast %cst_29 : f32 to vector<1x128xf32>
    %75 = arith.divf %73, %74 : vector<1x128xf32>
    %cst_30 = arith.constant 9.99999974E-6 : f32
    %76 = vector.broadcast %cst_30 : f32 to vector<1x128xf32>
    %77 = arith.addf %75, %76 : vector<1x128xf32>
    %78 = math.rsqrt %77 : vector<1x128xf32>
    %79 = arith.mulf %78, %61 : vector<1x128xf32>
    %80 = arith.mulf %66, %79 : vector<1x128xf32>
    %81 = arith.subf %62, %80 : vector<1x128xf32>
    %82 = vector.broadcast %79 : vector<1x128xf32> to vector<8x128xf32>
    %83 = arith.mulf %60, %82 : vector<8x128xf32>
    %84 = vector.broadcast %81 : vector<1x128xf32> to vector<8x128xf32>
    %85 = arith.addf %83, %84 : vector<8x128xf32>
    %cst_31 = arith.constant dense<0xFF800000> : vector<8xf32>
    %86 = vector.multi_reduction <maximumf>, %85, %cst_31 [1] : vector<8x128xf32> to vector<8xf32>
    %87 = vector.shape_cast %86 : vector<8xf32> to vector<8x1xf32>
    %88 = vector.broadcast %87 : vector<8x1xf32> to vector<8x128xf32>
    %89 = arith.subf %85, %88 : vector<8x128xf32>
    %90 = math.exp %89 : vector<8x128xf32>
    %cst_32 = arith.constant dense<0.000000e+00> : vector<8xf32>
    %91 = vector.multi_reduction <add>, %90, %cst_32 [1] : vector<8x128xf32> to vector<8xf32>
    %92 = vector.shape_cast %91 : vector<8xf32> to vector<8x1xf32>
    %93 = vector.broadcast %92 : vector<8x1xf32> to vector<8x128xf32>
    %94 = arith.divf %90, %93 : vector<8x128xf32>
    %c448 = arith.constant 448 : index
    %c0_33 = arith.constant 0 : index
    %95 = vector.load %arg1[%c448, %c0_33] : memref<960x256xf32, #tpu.memory_space<vmem>>, vector<128x128xf32>
    %cst_34 = arith.constant dense<0.000000e+00> : vector<8x128xf32>
    %96 = tpu.matmul %94, %95, %cst_34 {dimension_numbers = #tpu.dot_dimension_numbers<[1], [0], [0], [1], [0, 0, 1, 1], [], []>} : vector<8x128xf32>, vector<128x128xf32>, vector<8x128xf32> -> vector<8x128xf32>
    %c6 = arith.constant 6 : index
    %c0_35 = arith.constant 0 : index
    %97 = vector.load %arg2[%c6, %c0_35] : memref<16x256xf32, #tpu.memory_space<vmem>>, vector<1x128xf32>
    %c7 = arith.constant 7 : index
    %c0_36 = arith.constant 0 : index
    %98 = vector.load %arg2[%c7, %c0_36] : memref<16x256xf32, #tpu.memory_space<vmem>>, vector<1x128xf32>
    %cst_37 = arith.constant dense<0.000000e+00> : vector<128xf32>
    %99 = vector.multi_reduction <add>, %96, %cst_37 [0] : vector<8x128xf32> to vector<128xf32>
    %100 = vector.shape_cast %99 : vector<128xf32> to vector<1x128xf32>
    %cst_38 = arith.constant 8.000000e+00 : f32
    %101 = vector.broadcast %cst_38 : f32 to vector<1x128xf32>
    %102 = arith.divf %100, %101 : vector<1x128xf32>
    %103 = vector.broadcast %102 : vector<1x128xf32> to vector<8x128xf32>
    %104 = arith.subf %96, %103 : vector<8x128xf32>
    %105 = vector.broadcast %102 : vector<1x128xf32> to vector<8x128xf32>
    %106 = arith.subf %96, %105 : vector<8x128xf32>
    %107 = arith.mulf %104, %106 : vector<8x128xf32>
    %cst_39 = arith.constant dense<0.000000e+00> : vector<128xf32>
    %108 = vector.multi_reduction <add>, %107, %cst_39 [0] : vector<8x128xf32> to vector<128xf32>
    %109 = vector.shape_cast %108 : vector<128xf32> to vector<1x128xf32>
    %cst_40 = arith.constant 8.000000e+00 : f32
    %110 = vector.broadcast %cst_40 : f32 to vector<1x128xf32>
    %111 = arith.divf %109, %110 : vector<1x128xf32>
    %cst_41 = arith.constant 9.99999974E-6 : f32
    %112 = vector.broadcast %cst_41 : f32 to vector<1x128xf32>
    %113 = arith.addf %111, %112 : vector<1x128xf32>
    %114 = math.rsqrt %113 : vector<1x128xf32>
    %115 = arith.mulf %114, %97 : vector<1x128xf32>
    %116 = arith.mulf %102, %115 : vector<1x128xf32>
    %117 = arith.subf %98, %116 : vector<1x128xf32>
    %118 = vector.broadcast %115 : vector<1x128xf32> to vector<8x128xf32>
    %119 = arith.mulf %96, %118 : vector<8x128xf32>
    %120 = vector.broadcast %117 : vector<1x128xf32> to vector<8x128xf32>
    %121 = arith.addf %119, %120 : vector<8x128xf32>
    %cst_42 = arith.constant 0.000000e+00 : f32
    %122 = vector.broadcast %cst_42 : f32 to vector<8x128xf32>
    %123 = arith.maximumf %121, %122 : vector<8x128xf32>
    %c576 = arith.constant 576 : index
    %c0_43 = arith.constant 0 : index
    %124 = vector.load %arg1[%c576, %c0_43] : memref<960x256xf32, #tpu.memory_space<vmem>>, vector<128x256xf32>
    %cst_44 = arith.constant dense<0.000000e+00> : vector<8x256xf32>
    %125 = tpu.matmul %123, %124, %cst_44 {dimension_numbers = #tpu.dot_dimension_numbers<[1], [0], [0], [1], [0, 0, 1, 1], [], []>} : vector<8x128xf32>, vector<128x256xf32>, vector<8x256xf32> -> vector<8x256xf32>
    %c8 = arith.constant 8 : index
    %c0_45 = arith.constant 0 : index
    %126 = vector.load %arg2[%c8, %c0_45] : memref<16x256xf32, #tpu.memory_space<vmem>>, vector<1x256xf32>
    %c9 = arith.constant 9 : index
    %c0_46 = arith.constant 0 : index
    %127 = vector.load %arg2[%c9, %c0_46] : memref<16x256xf32, #tpu.memory_space<vmem>>, vector<1x256xf32>
    %cst_47 = arith.constant dense<0.000000e+00> : vector<256xf32>
    %128 = vector.multi_reduction <add>, %125, %cst_47 [0] : vector<8x256xf32> to vector<256xf32>
    %129 = vector.shape_cast %128 : vector<256xf32> to vector<1x256xf32>
    %cst_48 = arith.constant 8.000000e+00 : f32
    %130 = vector.broadcast %cst_48 : f32 to vector<1x256xf32>
    %131 = arith.divf %129, %130 : vector<1x256xf32>
    %132 = vector.broadcast %131 : vector<1x256xf32> to vector<8x256xf32>
    %133 = arith.subf %125, %132 : vector<8x256xf32>
    %134 = vector.broadcast %131 : vector<1x256xf32> to vector<8x256xf32>
    %135 = arith.subf %125, %134 : vector<8x256xf32>
    %136 = arith.mulf %133, %135 : vector<8x256xf32>
    %cst_49 = arith.constant dense<0.000000e+00> : vector<256xf32>
    %137 = vector.multi_reduction <add>, %136, %cst_49 [0] : vector<8x256xf32> to vector<256xf32>
    %138 = vector.shape_cast %137 : vector<256xf32> to vector<1x256xf32>
    %cst_50 = arith.constant 8.000000e+00 : f32
    %139 = vector.broadcast %cst_50 : f32 to vector<1x256xf32>
    %140 = arith.divf %138, %139 : vector<1x256xf32>
    %cst_51 = arith.constant 9.99999974E-6 : f32
    %141 = vector.broadcast %cst_51 : f32 to vector<1x256xf32>
    %142 = arith.addf %140, %141 : vector<1x256xf32>
    %143 = math.rsqrt %142 : vector<1x256xf32>
    %144 = arith.mulf %143, %126 : vector<1x256xf32>
    %145 = arith.mulf %131, %144 : vector<1x256xf32>
    %146 = arith.subf %127, %145 : vector<1x256xf32>
    %147 = vector.broadcast %144 : vector<1x256xf32> to vector<8x256xf32>
    %148 = arith.mulf %125, %147 : vector<8x256xf32>
    %149 = vector.broadcast %146 : vector<1x256xf32> to vector<8x256xf32>
    %150 = arith.addf %148, %149 : vector<8x256xf32>
    %cst_52 = arith.constant 0.000000e+00 : f32
    %151 = vector.broadcast %cst_52 : f32 to vector<8x256xf32>
    %152 = arith.maximumf %150, %151 : vector<8x256xf32>
    %c704 = arith.constant 704 : index
    %c0_53 = arith.constant 0 : index
    %153 = vector.load %arg1[%c704, %c0_53] : memref<960x256xf32, #tpu.memory_space<vmem>>, vector<256x64xf32>
    %cst_54 = arith.constant dense<0.000000e+00> : vector<8x64xf32>
    %154 = tpu.matmul %152, %153, %cst_54 {dimension_numbers = #tpu.dot_dimension_numbers<[1], [0], [0], [1], [0, 0, 1, 1], [], []>} : vector<8x256xf32>, vector<256x64xf32>, vector<8x64xf32> -> vector<8x64xf32>
    %c10 = arith.constant 10 : index
    %c0_55 = arith.constant 0 : index
    %155 = vector.load %arg2[%c10, %c0_55] : memref<16x256xf32, #tpu.memory_space<vmem>>, vector<1x64xf32>
    %156 = vector.broadcast %155 : vector<1x64xf32> to vector<8x64xf32>
    %157 = arith.addf %154, %156 : vector<8x64xf32>
    %c0_56 = arith.constant 0 : index
    %c0_57 = arith.constant 0 : index
    %158 = vector.load %arg3[%c0_56, %c0_57] : memref<8x64xf32, #tpu.memory_space<vmem>>, vector<8x64xf32>
    tpu.vector_store %arg3[%c0_56, %c0_57], %157 {strides = array<i32>} : memref<8x64xf32, #tpu.memory_space<vmem>>, vector<8x64xf32>,
    return
  }
}

</mosaic_0001>

<bundles_post_ra>
// kernel: tpu_custom_call.1
= control target key start
LH: loop header
LB: loop body
LE: loop exit
PB: predicated region body
PF: predicated region fallthrough
CT: control target
= control target key end

     0   :  { %8 = vsyncpa [#allocation3], 0  ;;  %s977_s0 = inlined_call_operand.hbm [shape: f32[8,64], index: 0, kind: input, shape index: {}]   ;;  %s978_s1 = inlined_call_operand.hbm [shape: f32[960,256], index: 1, kind: input, shape index: {}]   ;;  %s979_s2 = inlined_call_operand.hbm [shape: f32[16,256], index: 2, kind: input, shape index: {}]   ;;  %s980_s3 = inlined_call_operand.hbm [shape: f32[8,64], index: 3, kind: output, shape index: {}]  }
   0x1   :  { %9 = vsyncpa [#allocation6], 0  ;;  %s26_s14 = sshll.u32 %s978_s1, 4  ;;  %s27_s14 = int_to_ptr.hbm [resolvable:$true] %s26_s14 }
   0x2   :  { %10 = vsyncpa [#allocation4], 0  ;;  %s865_s15 = smov [#allocation5]   ;;  %s16_s19 = sshll.u32 %s977_s0, 4  ;;  %s17_s19 = int_to_ptr.hbm [resolvable:$true] %s16_s19 }
   0x3   :  { %s28_s16 = sshll.u32 %s865_s15, 4  ;;  %s866_s20 = smov 256   ;;  %s29_s16 = int_to_ptr.vmem [resolvable:$true] %s28_s16 }
   0x4   :  { %s867_s21 = smov 16   ;;  %s868_s22 = smov [#allocation2]  }
   0x5   :  { %34 = dma.hbm_to_vmem [thread:$0]  %s27_s14, 30720, %s29_s16, [#allocation6], %s866_s20, %s866_s20, %s867_s21  }
   0x6   :  { %s18_s23 = sshll.u32 %s868_s22, 4  ;;  %s39_s26 = sshll.u32 %s979_s2, 4  ;;  %s19_s23 = int_to_ptr.vmem [resolvable:$true] %s18_s23  ;;  %s40_s26 = int_to_ptr.hbm [resolvable:$true] %s39_s26 }
   0x7   :  { %21 = dma.hbm_to_vmem [thread:$0]  %s17_s19, 128, %s19_s23, [#allocation3]  }
   0x8   :  { %s869_s1 = smov [#allocation7]  }
   0x9   :  { %s41_s27 = sshll.u32 %s869_s1, 4  ;;  %s42_s27 = int_to_ptr.vmem [resolvable:$true] %s41_s27 }
   0xa   :  { %47 = dma.hbm_to_vmem [thread:$0]  %s40_s26, 512, %s42_s27, [#allocation6], %s866_s20, %s866_s20, %s867_s21  }
   0xb   :  { %859 = dma.done.wait [#allocation3], 128  }
   0xc   :  { %860 = vsyncadd [#allocation3], 4294967168 }
   0xd   :  { %861 = dma.done.wait [#allocation6], 31232  }
   0xe   :  { %862 = vsyncadd [#allocation6], 4294936064  ;;  %v75_v0 = vld [vmem:[#allocation5 + $0x70] sm:$0xff]  ;;  %v76_v1 = vld [vmem:[#allocation5 + $0x78] sm:$0xff]  ;;  %vm77_vm0 = vcmask 523264   ;;  %v870_v17 = vmov 8.0  }
   0xf   :  { %v73_v2 = vld [vmem:[#allocation5 + $0x60] sm:$0xff]  ;;  %89 = vmatpush.msra.mxu0 %v75_v0  ;;  %109 = vmatpush.msra.mxu1 %v76_v1  ;;  %v74_v3 = vld [vmem:[#allocation5 + $0x68] sm:$0xff]  ;;  %v71_v4 = vld [vmem:[#allocation5 + $0x50] sm:$0xff]  ;;  %743 = vrcp.f32 %v870_v17  ;;  %vm197_vm8 = vcmask 1040384   ;;  %s871_s0 = smov [#allocation8]   ;;  %s723_s30 = sshll.u32 %s980_s3, 4  ;;  %s724_s30 = int_to_ptr.hbm [resolvable:$true] %s723_s30 }
  0x10   :  { %v72_v5 = vld [vmem:[#allocation5 + $0x58] sm:$0xff]  ;;  %v69_v6 = vld [vmem:[#allocation5 + $0x40] sm:$0xff]  ;;  %v70_v7 = vld [vmem:[#allocation5 + $0x48] sm:$0xff]  ;;  %s721_s2 = sshll.u32 %s871_s0, 4  ;;  %s722_s2 = int_to_ptr.vmem [resolvable:$true] %s721_s2 }
  0x11   :  { %90 = vmatpush.msra.mxu0 %v73_v2  ;;  %110 = vmatpush.msra.mxu1 %v74_v3  ;;  %v67_v8 = vld [vmem:[#allocation5 + $0x30] sm:$0xff]  ;;  %v68_v9 = vld [vmem:[#allocation5 + $0x38] sm:$0xff]  ;;  %v65_v10 = vld [vmem:[#allocation5 + $0x20] sm:$0xff] }
  0x12   :  { %v66_v11 = vld [vmem:[#allocation5 + $0x28] sm:$0xff]  ;;  %v63_v12 = vld [vmem:[#allocation5 + $0x10] sm:$0xff]  ;;  %v64_v13 = vld [vmem:[#allocation5 + $0x18] sm:$0xff] }
  0x13   :  { %91 = vmatpush.msra.mxu0 %v71_v4  ;;  %111 = vmatpush.msra.mxu1 %v72_v5  ;;  %v61_v14 = vld [vmem:[#allocation5] sm:$0xff]  ;;  %v62_v15 = vld [vmem:[#allocation5 + $0x8] sm:$0xff]  ;;  %v60_v16 = vld [vmem:[#allocation2] sm:$0xff] }
  0x14   :  { %v229_v30 = vld [vmem:[#allocation5 + $0x170] sm:$0xff]  ;;  %v228_v35 = vld [vmem:[#allocation5 + $0x160] sm:$0xff] }
  0x15   :  { %92 = vmatpush.msra.mxu0 %v69_v6  ;;  %112 = vmatpush.msra.mxu1 %v70_v7  ;;  %v744_v18 = vpop.eup %743  ;;  %v245_v31 = vld [vmem:[#allocation5 + $0x270] sm:$0xff]  ;;  %v244_v36 = vld [vmem:[#allocation5 + $0x260] sm:$0xff] }
  0x16   :  { %v137_v19 = vmul.f32 8.0, %v744_v18  ;;  %246 = vmatpush.msra.mxu2 %v229_v30  ;;  %266 = vmatpush.msra.mxu3 %v245_v31  ;;  %vm141_vm1 = vweird.f32 %v744_v18  ;;  %v227_v39 = vld [vmem:[#allocation5 + $0x150] sm:$0xff]  ;;  %v226_v44 = vld [vmem:[#allocation5 + $0x140] sm:$0xff] }
  0x17   :  { %93 = vmatpush.msra.mxu0 %v67_v8  ;;  %113 = vmatpush.msra.mxu1 %v68_v9  ;;  %v243_v40 = vld [vmem:[#allocation5 + $0x250] sm:$0xff]  ;;  %v242_v45 = vld [vmem:[#allocation5 + $0x240] sm:$0xff] }
  0x18   :  { %v138_v20 = vsub.f32 1.0, %v137_v19  ;;  %247 = vmatpush.msra.mxu2 %v228_v35  ;;  %267 = vmatpush.msra.mxu3 %v244_v36  ;;  %v225_v48 = vld [vmem:[#allocation5 + $0x130] sm:$0xff]  ;;  %v224_v52 = vld [vmem:[#allocation5 + $0x120] sm:$0xff] }
  0x19   :  { %94 = vmatpush.msra.mxu0 %v65_v10  ;;  %114 = vmatpush.msra.mxu1 %v66_v11  ;;  %v241_v49 = vld [vmem:[#allocation5 + $0x230] sm:$0xff]  ;;  %v240_v53 = vld [vmem:[#allocation5 + $0x220] sm:$0xff] }
  0x1a   :  { %v139_v25 = vmul.f32 %v744_v18, %v138_v20  ;;  %248 = vmatpush.msra.mxu2 %v227_v39  ;;  %268 = vmatpush.msra.mxu3 %v243_v40  ;;  %v223_v56 = vld [vmem:[#allocation5 + $0x110] sm:$0xff]  ;;  %v222_v60 = vld [vmem:[#allocation5 + $0x100] sm:$0xff] }
  0x1b   :  { %95 = vmatpush.msra.mxu0 %v63_v12  ;;  %115 = vmatpush.msra.mxu1 %v64_v13  ;;  %v239_v57 = vld [vmem:[#allocation5 + $0x210] sm:$0xff]  ;;  %v238_v61 = vld [vmem:[#allocation5 + $0x200] sm:$0xff] }
  0x1c   :  { %v140_v32 = vadd.f32 %v744_v18, %v139_v25  ;;  %249 = vmatpush.msra.mxu2 %v226_v44  ;;  %269 = vmatpush.msra.mxu3 %v242_v45  ;;  %v221_v0 = vld [vmem:[#allocation5 + $0xf0] sm:$0xff]  ;;  %v220_v4 = vld [vmem:[#allocation5 + $0xe0] sm:$0xff] }
  0x1d   :  { %96 = vmatpush.msra.mxu0 %v61_v14  ;;  %116 = vmatpush.msra.mxu1 %v62_v15  ;;  %v237_v1 = vld [vmem:[#allocation5 + $0x1f0] sm:$0xff]  ;;  %v236_v5 = vld [vmem:[#allocation5 + $0x1e0] sm:$0xff] }
  0x1e   :  { %734 = vmatmul.msk.f32.vlgmr.msra.gmra.mxu0 %vm77_vm0, %v60_v16  ;;  %735 = vmatmul.msk.f32.vlgmr.msra.gmra.mxu1 %vm77_vm0, %v60_v16  ;;  %v911_v41 = vsel %vm141_vm1, %v744_v18, %v140_v32  ;;  %v219_v8 = vld [vmem:[#allocation5 + $0xd0] sm:$0xff]  ;;  %v218_v10 = vld [vmem:[#allocation5 + $0xc0] sm:$0xff] }
  0x1f   :  { %250 = vmatpush.msra.mxu2 %v225_v48  ;;  %270 = vmatpush.msra.mxu3 %v241_v49  ;;  %v235_v9 = vld [vmem:[#allocation5 + $0x1d0] sm:$0xff]  ;;  %v234_v11 = vld [vmem:[#allocation5 + $0x1c0] sm:$0xff] }
  0x20   :  { %v217_v14 = vld [vmem:[#allocation5 + $0xb0] sm:$0xff]  ;;  %v216_v18 = vld [vmem:[#allocation5 + $0xa0] sm:$0xff] }
  0x21   :  { %251 = vmatpush.msra.mxu2 %v224_v52  ;;  %271 = vmatpush.msra.mxu3 %v240_v53  ;;  %v233_v15 = vld [vmem:[#allocation5 + $0x1b0] sm:$0xff]  ;;  %v232_v19 = vld [vmem:[#allocation5 + $0x1a0] sm:$0xff] }
  0x22   :  { %v231_v25 = vld [vmem:[#allocation5 + $0x190] sm:$0xff] }
  0x23   :  { %252 = vmatpush.msra.mxu2 %v223_v56  ;;  %272 = vmatpush.msra.mxu3 %v239_v57 }
  0x25   :  { %253 = vmatpush.msra.mxu2 %v222_v60  ;;  %273 = vmatpush.msra.mxu3 %v238_v61 }
  0x27   :  { %254 = vmatpush.msra.mxu2 %v221_v0  ;;  %274 = vmatpush.msra.mxu3 %v237_v1 }
  0x29   :  { %255 = vmatpush.msra.mxu2 %v220_v4  ;;  %275 = vmatpush.msra.mxu3 %v236_v5  ;;  %v336_v5 = vld [vmem:[#allocation5 + $0x370] sm:$0xff] }
  0x2a   :  { %337 = vmatpush.msrb.mxu0 %v336_v5 }
  0x2b   :  { %256 = vmatpush.msra.mxu2 %v219_v8  ;;  %276 = vmatpush.msra.mxu3 %v235_v9  ;;  %v333_v8 = vld [vmem:[#allocation5 + $0x340] sm:$0xff] }
  0x2d   :  { %257 = vmatpush.msra.mxu2 %v218_v10  ;;  %277 = vmatpush.msra.mxu3 %v234_v11  ;;  %v332_v10 = vld [vmem:[#allocation5 + $0x330] sm:$0xff] }
  0x2f   :  { %258 = vmatpush.msra.mxu2 %v217_v14  ;;  %278 = vmatpush.msra.mxu3 %v233_v15  ;;  %v330_v14 = vld [vmem:[#allocation5 + $0x310] sm:$0xff] }
  0x31   :  { %259 = vmatpush.msra.mxu2 %v216_v18  ;;  %279 = vmatpush.msra.mxu3 %v232_v19  ;;  %v328_v18 = vld [vmem:[#allocation5 + $0x2f0] sm:$0xff] }
  0x33   :  { %280 = vmatpush.msra.mxu3 %v231_v25 }
  0x9b   :  { %v903_v21 = vpop.f32.mrf.mxu0  ;;  %v905_v22 = vpop.f32.mrf.mxu1 }
  0x9c   :  { %v124_v23 = vrot.slane %v903_v21, 4  ;;  %v130_v24 = vrot.slane %v905_v22, 4 }
  0x9e   :  { %v125_v26 = vadd.f32 %v124_v23, %v903_v21  ;;  %v131_v27 = vadd.f32 %v130_v24, %v905_v22  ;;  %v215_v24 = vld [vmem:[#allocation5 + $0x90] sm:$0xff] }
  0x9f   :  { %260 = vmatpush.msra.mxu2 %v215_v24  ;;  %v326_v24 = vld [vmem:[#allocation5 + $0x2d0] sm:$0xff] }
  0xa0   :  { %v126_v28 = vrot.slane %v125_v26, 2  ;;  %v132_v29 = vrot.slane %v131_v27, 2 }
  0xa2   :  { %v127_v33 = vadd.f32 %v126_v28, %v125_v26  ;;  %v133_v34 = vadd.f32 %v132_v29, %v131_v27  ;;  %v214_v28 = vld [vmem:[#allocation5 + $0x80] sm:$0xff] }
  0xa3   :  { %v230_v29 = vld [vmem:[#allocation5 + $0x180] sm:$0xff]  ;;  %261 = vmatpush.msra.mxu2 %v214_v28  ;;  %v324_v28 = vld [vmem:[#allocation5 + $0x2b0] sm:$0xff] }
  0xa4   :  { %v128_v37 = vrot.slane %v127_v33, 1  ;;  %v134_v38 = vrot.slane %v133_v34, 1  ;;  %281 = vmatpush.msra.mxu3 %v230_v29 }
  0xa6   :  { %v129_v42 = vadd.f32 %v128_v37, %v127_v33  ;;  %v135_v43 = vadd.f32 %v134_v38, %v133_v34  ;;  %v121_v37 = vld [vmem:[#allocation7] ss:$8 sm:$0x3] }
  0xa7   :  { %v186_v44 = vperm.slane %v121_v37, 0 }
  0xa8   :  { %v914_v46 = vmul.f32 %v911_v41, %v129_v42  ;;  %v917_v47 = vmul.f32 %v911_v41, %v135_v43  ;;  %v187_v42 = vperm.slane %v121_v37, 1 }
  0xaa   :  { %v145_v50 = vsub.f32 %v903_v21, %v914_v46  ;;  %v146_v51 = vsub.f32 %v905_v22, %v917_v47 }
  0xac   :  { %v147_v54 = vmul.f32 %v145_v50, %v145_v50  ;;  %v148_v55 = vmul.f32 %v146_v51, %v146_v51 }
  0xae   :  { %v149_v58 = vrot.slane %v147_v54, 4  ;;  %v155_v59 = vrot.slane %v148_v55, 4 }
  0xb0   :  { %v150_v62 = vadd.f32 %v149_v58, %v147_v54  ;;  %v156_v63 = vadd.f32 %v155_v59, %v148_v55  ;;  %v123_v54 = vld [vmem:[#allocation7 + $0x1] ss:$8 sm:$0x3] }
  0xb2   :  { %v151_v2 = vrot.slane %v150_v62, 2  ;;  %v157_v3 = vrot.slane %v156_v63, 2 }
  0xb4   :  { %v152_v6 = vadd.f32 %v151_v2, %v150_v62  ;;  %v158_v7 = vadd.f32 %v157_v3, %v156_v63 }
  0xb6   :  { %v153_v12 = vrot.slane %v152_v6, 1  ;;  %v159_v13 = vrot.slane %v158_v7, 1 }
  0xb8   :  { %v154_v16 = vadd.f32 %v153_v12, %v152_v6  ;;  %v160_v17 = vadd.f32 %v159_v13, %v158_v7  ;;  %v335_v6 = vld [vmem:[#allocation5 + $0x360] sm:$0xff] }
  0xb9   :  { %338 = vmatpush.msrb.mxu0 %v335_v6  ;;  %v331_v12 = vld [vmem:[#allocation5 + $0x320] sm:$0xff] }
  0xba   :  { %v161_v20 = vmul.f32 %v154_v16, %v911_v41  ;;  %v162_v23 = vmul.f32 %v160_v17, %v911_v41  ;;  %v329_v16 = vld [vmem:[#allocation5 + $0x300] sm:$0xff] }
  0xbc   :  { %v163_v26 = vadd.f32 1e-05, %v161_v20  ;;  %v164_v27 = vadd.f32 1e-05, %v162_v23  ;;  %v327_v20 = vld [vmem:[#allocation5 + $0x2e0] sm:$0xff] }
  0xbe   :  { %745 = vrsqrt.f32 %v163_v26  ;;  %vm171_vm4 = vweird.f32 %v163_v26  ;;  %vm181_vm5 = vweird.f32 %v164_v27 }
  0xbf   :  { %747 = vrsqrt.f32 %v164_v27 }
  0xc4   :  { %v746_v30 = vpop.eup %745 }
  0xc5   :  { %v748_v31 = vpop.eup %747  ;;  %v166_v32 = vmul.f32 %v746_v30, %v163_v26  ;;  %vm172_vm2 = vweird.f32 %v746_v30  ;;  %v325_v26 = vld [vmem:[#allocation5 + $0x2c0] sm:$0xff] }
  0xc6   :  { %v176_v33 = vmul.f32 %v748_v31, %v164_v27  ;;  %vm182_vm3 = vweird.f32 %v748_v31  ;;  %vm173_vm6 = vmor %vm171_vm4, %vm172_vm2 }
  0xc7   :  { %v167_v34 = vmul.f32 %v746_v30, %v166_v32  ;;  %vm183_vm7 = vmor %vm181_vm5, %vm182_vm3  ;;  %v322_v32 = vld [vmem:[#allocation5 + $0x290] sm:$0xff] }
  0xc8   :  { %v177_v35 = vmul.f32 %v748_v31, %v176_v33 }
  0xc9   :  { %v168_v36 = vmul.f32 0.5, %v167_v34  ;;  %v321_v34 = vld [vmem:[#allocation5 + $0x280] sm:$0xff] }
  0xca   :  { %v178_v38 = vmul.f32 0.5, %v177_v35 }
  0xcb   :  { %v169_v39 = vsub.f32 1.5, %v168_v36 }
  0xcc   :  { %v179_v40 = vsub.f32 1.5, %v178_v38 }
  0xcd   :  { %v170_v43 = vmul.f32 %v746_v30, %v169_v39 }
  0xce   :  { %v180_v45 = vmul.f32 %v748_v31, %v179_v40 }
  0xcf   :  { %v174_v48 = vsel %vm173_vm6, %v746_v30, %v170_v43  ;;  %v323_v30 = vld [vmem:[#allocation5 + $0x2a0] sm:$0xff] }
  0xd0   :  { %v184_v49 = vsel %vm183_vm7, %v748_v31, %v180_v45  ;;  %v190_v51 = vmul.f32 %v186_v44, %v174_v48  ;;  %v286_v44 = vld [vmem:[#allocation7 + $0x2] ss:$0 sm:$0xff] }
  0xd1   :  { %v191_v50 = vmul.f32 %v187_v42, %v184_v49 }
  0xd2   :  { %v192_v55 = vmul.f32 %v190_v51, %v914_v46  ;;  %v201_v56 = vperm.slane %v190_v51, 0 }
  0xd3   :  { %v193_v52 = vmul.f32 %v191_v50, %v917_v47  ;;  %v202_v57 = vperm.slane %v191_v50, 0  ;;  %v287_v50 = vld [vmem:[#allocation7 + $0x3] ss:$0 sm:$0xff] }
  0xd4   :  { %v203_v60 = vmul.f32 %v201_v56, %v903_v21  ;;  %v334_v21 = vld [vmem:[#allocation5 + $0x350] sm:$0xff] }
  0xd5   :  { %v196_v53 = vrot.slane %v193_v52, 7  ;;  %v204_v62 = vmul.f32 %v202_v57, %v905_v22  ;;  %339 = vmatpush.msrb.mxu0 %v334_v21 }
  0xd7   :  { %v198_v58 = vsel %vm197_vm8, %v192_v55, %v196_v53  ;;  %340 = vmatpush.msrb.mxu0 %v333_v8 }
  0xd8   :  { %v200_v59 = vsub.f32 %v123_v54, %v198_v58 }
  0xd9   :  { %341 = vmatpush.msrb.mxu0 %v332_v10 }
  0xda   :  { %v206_v61 = vperm.slane %v200_v59, 0  ;;  %v207_v63 = vperm.slane %v200_v59, 1 }
  0xdb   :  { %342 = vmatpush.msrb.mxu0 %v331_v12 }
  0xdc   :  { %v210_v0 = vadd.f32 %v206_v61, %v203_v60  ;;  %v211_v1 = vadd.f32 %v207_v63, %v204_v62 }
  0xdd   :  { %343 = vmatpush.msrb.mxu0 %v330_v14 }
  0xde   :  { %v212_v2 = vmax.f32 %v210_v0, 0.0  ;;  %v213_v47 = vmax.f32 %v211_v1, 0.0 }
  0xdf   :  { %344 = vmatpush.msrb.mxu0 %v329_v16 }
  0xe0   :  { %262 = vmatmul.f32.vlgmr.msra.gmra.mxu2 %v212_v2  ;;  %282 = vmatmul.f32.vlgmr.msra.gmra.mxu3 %v213_v47 }
  0xe1   :  { %345 = vmatpush.msrb.mxu0 %v328_v18 }
  0xe3   :  { %346 = vmatpush.msrb.mxu0 %v327_v20  ;;  %v428_v20 = vld [vmem:[#allocation5 + $0x470] sm:$0xff] }
  0xe4   :  { %429 = vmatpush.msrb.mxu1 %v428_v20  ;;  %v494_v20 = vld [vmem:[#allocation5 + $0x4d0] sm:$0xff] }
  0xe5   :  { %347 = vmatpush.msrb.mxu0 %v326_v24  ;;  %v426_v24 = vld [vmem:[#allocation5 + $0x450] sm:$0xff] }
  0xe7   :  { %348 = vmatpush.msrb.mxu0 %v325_v26  ;;  %v424_v26 = vld [vmem:[#allocation5 + $0x430] sm:$0xff] }
  0xe9   :  { %349 = vmatpush.msrb.mxu0 %v324_v28 }
  0xeb   :  { %350 = vmatpush.msrb.mxu0 %v323_v30 }
  0xed   :  { %351 = vmatpush.msrb.mxu0 %v322_v32  ;;  %v422_v32 = vld [vmem:[#allocation5 + $0x410] sm:$0xff] }
  0xef   :  { %352 = vmatpush.msrb.mxu0 %v321_v34  ;;  %v420_v34 = vld [vmem:[#allocation5 + $0x3f0] sm:$0xff] }
 0x163   :  { %v263_v3 = vpop.f32.mrf.mxu2  ;;  %v283_v4 = vpop.f32.mrf.mxu3 }
 0x164   :  { %v930_v46 = vadd.f32 %v283_v4, %v263_v3 }
 0x166   :  { %v288_v7 = vrot.slane %v930_v46, 4 }
 0x168   :  { %v289_v22 = vadd.f32 %v288_v7, %v930_v46 }
 0x16a   :  { %v290_v9 = vrot.slane %v289_v22, 2 }
 0x16c   :  { %v291_v11 = vadd.f32 %v290_v9, %v289_v22 }
 0x16e   :  { %v292_v13 = vrot.slane %v291_v11, 1 }
 0x170   :  { %v293_v15 = vadd.f32 %v292_v13, %v291_v11  ;;  %v357_v11 = vld [vmem:[#allocation7 + $0x4] ss:$0 sm:$0xff] }
 0x172   :  { %v294_v17 = vmul.f32 %v293_v15, %v911_v41  ;;  %v358_v15 = vld [vmem:[#allocation7 + $0x5] ss:$0 sm:$0xff] }
 0x174   :  { %v295_v19 = vsub.f32 %v930_v46, %v294_v17 }
 0x176   :  { %v296_v23 = vmul.f32 %v295_v19, %v295_v19 }
 0x178   :  { %v297_v25 = vrot.slane %v296_v23, 4 }
 0x17a   :  { %v298_v27 = vadd.f32 %v297_v25, %v296_v23  ;;  %v427_v23 = vld [vmem:[#allocation5 + $0x460] sm:$0xff] }
 0x17b   :  { %430 = vmatpush.msrb.mxu1 %v427_v23  ;;  %v425_v25 = vld [vmem:[#allocation5 + $0x440] sm:$0xff]  ;;  %v495_v23 = vld [vmem:[#allocation5 + $0x4d8] sm:$0xff] }
 0x17c   :  { %v299_v29 = vrot.slane %v298_v27, 2 }
 0x17d   :  { %431 = vmatpush.msrb.mxu1 %v426_v24 }
 0x17e   :  { %v300_v31 = vadd.f32 %v299_v29, %v298_v27  ;;  %v423_v27 = vld [vmem:[#allocation5 + $0x420] sm:$0xff] }
 0x17f   :  { %432 = vmatpush.msrb.mxu1 %v425_v25  ;;  %v492_v25 = vld [vmem:[#allocation5 + $0x4c0] sm:$0xff] }
 0x180   :  { %v301_v33 = vrot.slane %v300_v31, 1 }
 0x181   :  { %433 = vmatpush.msrb.mxu1 %v424_v26  ;;  %v493_v26 = vld [vmem:[#allocation5 + $0x4c8] sm:$0xff] }
 0x182   :  { %v302_v35 = vadd.f32 %v301_v33, %v300_v31  ;;  %v421_v33 = vld [vmem:[#allocation5 + $0x400] sm:$0xff] }
 0x183   :  { %434 = vmatpush.msrb.mxu1 %v423_v27 }
 0x184   :  { %v303_v36 = vmul.f32 %v302_v35, %v911_v41  ;;  %v419_v35 = vld [vmem:[#allocation5 + $0x3e0] sm:$0xff] }
 0x185   :  { %435 = vmatpush.msrb.mxu1 %v422_v32 }
 0x186   :  { %v304_v37 = vadd.f32 1e-05, %v303_v36  ;;  %v418_v36 = vld [vmem:[#allocation5 + $0x3d0] sm:$0xff] }
 0x187   :  { %436 = vmatpush.msrb.mxu1 %v421_v33  ;;  %v486_v33 = vld [vmem:[#allocation5 + $0x490] sm:$0xff] }
 0x188   :  { %749 = vrsqrt.f32 %v304_v37  ;;  %vm311_vm10 = vweird.f32 %v304_v37 }
 0x189   :  { %437 = vmatpush.msrb.mxu1 %v420_v34  ;;  %v487_v34 = vld [vmem:[#allocation5 + $0x498] sm:$0xff] }
 0x18b   :  { %438 = vmatpush.msrb.mxu1 %v419_v35 }
 0x18d   :  { %439 = vmatpush.msrb.mxu1 %v418_v36  ;;  %v484_v36 = vld [vmem:[#allocation5 + $0x480] sm:$0xff] }
 0x18e   :  { %v750_v38 = vpop.eup %749 }
 0x18f   :  { %v306_v39 = vmul.f32 %v750_v38, %v304_v37  ;;  %vm312_vm9 = vweird.f32 %v750_v38  ;;  %v417_v37 = vld [vmem:[#allocation5 + $0x3c0] sm:$0xff] }
 0x190   :  { %vm313_vm11 = vmor %vm311_vm10, %vm312_vm9  ;;  %440 = vmatpush.msrb.mxu1 %v417_v37  ;;  %v485_v37 = vld [vmem:[#allocation5 + $0x488] sm:$0xff] }
 0x191   :  { %v307_v40 = vmul.f32 %v750_v38, %v306_v39  ;;  %v415_v39 = vld [vmem:[#allocation5 + $0x3a0] sm:$0xff] }
 0x193   :  { %v308_v42 = vmul.f32 0.5, %v307_v40  ;;  %v414_v40 = vld [vmem:[#allocation5 + $0x390] sm:$0xff] }
 0x195   :  { %v309_v43 = vsub.f32 1.5, %v308_v42  ;;  %v413_v42 = vld [vmem:[#allocation5 + $0x380] sm:$0xff] }
 0x197   :  { %v310_v45 = vmul.f32 %v750_v38, %v309_v43 }
 0x199   :  { %v314_v48 = vsel %vm313_vm11, %v750_v38, %v310_v45  ;;  %v416_v38 = vld [vmem:[#allocation5 + $0x3b0] sm:$0xff] }
 0x19a   :  { %v315_v49 = vmul.f32 %v314_v48, %v286_v44  ;;  %441 = vmatpush.msrb.mxu1 %v416_v38 }
 0x19c   :  { %v316_v51 = vmul.f32 %v315_v49, %v294_v17  ;;  %v318_v53 = vmul.f32 %v315_v49, %v930_v46  ;;  %442 = vmatpush.msrb.mxu1 %v415_v39 }
 0x19e   :  { %v317_v52 = vsub.f32 %v287_v50, %v316_v51  ;;  %443 = vmatpush.msrb.mxu1 %v414_v40 }
 0x1a0   :  { %v319_v54 = vadd.f32 %v318_v53, %v317_v52  ;;  %444 = vmatpush.msrb.mxu1 %v413_v42 }
 0x1a2   :  { %v320_v55 = vmax.f32 %v319_v54, 0.0 }
 0x1a4   :  { %353 = vmatmul.f32.vlgmr.msrb.gmra.mxu0 %v320_v55 }
 0x221   :  { %v354_v56 = vpop.f32.mrf.mxu0 }
 0x222   :  { %v359_v57 = vrot.slane %v354_v56, 4 }
 0x224   :  { %v360_v58 = vadd.f32 %v359_v57, %v354_v56  ;;  %v514_v57 = vld [vmem:[#allocation5 + $0x570] sm:$0xff] }
 0x225   :  { %516 = vmatpush.msrb.mxu2 %v514_v57 }
 0x226   :  { %v361_v59 = vrot.slane %v360_v58, 2 }
 0x228   :  { %v362_v60 = vadd.f32 %v361_v59, %v360_v58  ;;  %v515_v58 = vld [vmem:[#allocation5 + $0x578] sm:$0xff] }
 0x229   :  { %536 = vmatpush.msrb.mxu3 %v515_v58 }
 0x22a   :  { %v363_v61 = vrot.slane %v362_v60, 1 }
 0x22c   :  { %v364_v62 = vadd.f32 %v363_v61, %v362_v60  ;;  %v512_v61 = vld [vmem:[#allocation5 + $0x560] sm:$0xff] }
 0x22d   :  { %517 = vmatpush.msrb.mxu2 %v512_v61 }
 0x22e   :  { %v365_v63 = vmul.f32 %v364_v62, %v911_v41  ;;  %v513_v62 = vld [vmem:[#allocation5 + $0x568] sm:$0xff] }
 0x22f   :  { %537 = vmatpush.msrb.mxu3 %v513_v62 }
 0x230   :  { %v366_v0 = vsub.f32 %v354_v56, %v365_v63 }
 0x232   :  { %v367_v1 = vmul.f32 %v366_v0, %v366_v0  ;;  %v510_v0 = vld [vmem:[#allocation5 + $0x550] sm:$0xff] }
 0x233   :  { %518 = vmatpush.msrb.mxu2 %v510_v0 }
 0x234   :  { %v368_v2 = vrot.slane %v367_v1, 4 }
 0x236   :  { %v369_v47 = vadd.f32 %v368_v2, %v367_v1  ;;  %v511_v1 = vld [vmem:[#allocation5 + $0x558] sm:$0xff] }
 0x237   :  { %538 = vmatpush.msrb.mxu3 %v511_v1 }
 0x238   :  { %v370_v3 = vrot.slane %v369_v47, 2 }
 0x23a   :  { %v371_v4 = vadd.f32 %v370_v3, %v369_v47  ;;  %v508_v47 = vld [vmem:[#allocation5 + $0x540] sm:$0xff]  ;;  %v509_v3 = vld [vmem:[#allocation5 + $0x548] sm:$0xff] }
 0x23b   :  { %519 = vmatpush.msrb.mxu2 %v508_v47  ;;  %539 = vmatpush.msrb.mxu3 %v509_v3  ;;  %v673_v3 = vld [vmem:[#allocation5 + $0x770] sm:$0xff] }
 0x23c   :  { %v372_v5 = vrot.slane %v371_v4, 1  ;;  %695 = vmatpush.msra.mxu1 %v673_v3 }
 0x23e   :  { %v373_v46 = vadd.f32 %v372_v5, %v371_v4  ;;  %v506_v5 = vld [vmem:[#allocation5 + $0x530] sm:$0xff] }
 0x23f   :  { %520 = vmatpush.msrb.mxu2 %v506_v5 }
 0x240   :  { %v374_v6 = vmul.f32 %v373_v46, %v911_v41  ;;  %v507_v46 = vld [vmem:[#allocation5 + $0x538] sm:$0xff] }
 0x241   :  { %540 = vmatpush.msrb.mxu3 %v507_v46  ;;  %v656_v46 = vld [vmem:[#allocation5 + $0x660] sm:$0xff] }
 0x242   :  { %v375_v7 = vadd.f32 1e-05, %v374_v6 }
 0x244   :  { %751 = vrsqrt.f32 %v375_v7  ;;  %vm382_vm13 = vweird.f32 %v375_v7 }
 0x24a   :  { %v752_v21 = vpop.eup %751 }
 0x24b   :  { %v377_v22 = vmul.f32 %v752_v21, %v375_v7  ;;  %vm383_vm12 = vweird.f32 %v752_v21  ;;  %v504_v7 = vld [vmem:[#allocation5 + $0x520] sm:$0xff] }
 0x24c   :  { %vm384_vm14 = vmor %vm382_vm13, %vm383_vm12  ;;  %521 = vmatpush.msrb.mxu2 %v504_v7 }
 0x24d   :  { %v378_v8 = vmul.f32 %v752_v21, %v377_v22 }
 0x24f   :  { %v379_v9 = vmul.f32 0.5, %v378_v8  ;;  %v502_v8 = vld [vmem:[#allocation5 + $0x510] sm:$0xff] }
 0x250   :  { %522 = vmatpush.msrb.mxu2 %v502_v8  ;;  %v671_v8 = vld [vmem:[#allocation5 + $0x750] sm:$0xff] }
 0x251   :  { %v380_v10 = vsub.f32 1.5, %v379_v9  ;;  %v503_v9 = vld [vmem:[#allocation5 + $0x518] sm:$0xff] }
 0x253   :  { %v381_v12 = vmul.f32 %v752_v21, %v380_v10 }
 0x255   :  { %v385_v13 = vsel %vm384_vm14, %v752_v21, %v381_v12  ;;  %v505_v21 = vld [vmem:[#allocation5 + $0x528] sm:$0xff] }
 0x256   :  { %v386_v14 = vmul.f32 %v385_v13, %v357_v11  ;;  %541 = vmatpush.msrb.mxu3 %v505_v21  ;;  %v500_v11 = vld [vmem:[#allocation5 + $0x500] sm:$0xff]  ;;  %v501_v12 = vld [vmem:[#allocation5 + $0x508] sm:$0xff] }
 0x257   :  { %523 = vmatpush.msrb.mxu2 %v500_v11  ;;  %v654_v11 = vld [vmem:[#allocation5 + $0x640] sm:$0xff] }
 0x258   :  { %v387_v16 = vmul.f32 %v386_v14, %v365_v63  ;;  %v389_v18 = vmul.f32 %v386_v14, %v354_v56  ;;  %542 = vmatpush.msrb.mxu3 %v503_v9  ;;  %v498_v14 = vld [vmem:[#allocation5 + $0x4f0] sm:$0xff] }
 0x259   :  { %524 = vmatpush.msrb.mxu2 %v498_v14 }
 0x25a   :  { %v388_v17 = vsub.f32 %v358_v15, %v387_v16  ;;  %543 = vmatpush.msrb.mxu3 %v501_v12  ;;  %v499_v15 = vld [vmem:[#allocation5 + $0x4f8] sm:$0xff]  ;;  %v670_v12 = vld [vmem:[#allocation5 + $0x740] sm:$0xff] }
 0x25c   :  { %v390_v19 = vadd.f32 %v389_v18, %v388_v17  ;;  %544 = vmatpush.msrb.mxu3 %v499_v15  ;;  %v496_v17 = vld [vmem:[#allocation5 + $0x4e0] sm:$0xff]  ;;  %v497_v18 = vld [vmem:[#allocation5 + $0x4e8] sm:$0xff]  ;;  %v653_v15 = vld [vmem:[#allocation5 + $0x630] sm:$0xff] }
 0x25d   :  { %525 = vmatpush.msrb.mxu2 %v496_v17 }
 0x25e   :  { %391 = vmax.xlane.f32.xlu0 %v390_v19  ;;  %545 = vmatpush.msrb.mxu3 %v497_v18 }
 0x25f   :  { %526 = vmatpush.msrb.mxu2 %v494_v20  ;;  %v668_v20 = vld [vmem:[#allocation5 + $0x720] sm:$0xff] }
 0x260   :  { %546 = vmatpush.msrb.mxu3 %v495_v23 }
 0x261   :  { %527 = vmatpush.msrb.mxu2 %v492_v25  ;;  %v651_v25 = vld [vmem:[#allocation5 + $0x610] sm:$0xff] }
 0x262   :  { %547 = vmatpush.msrb.mxu3 %v493_v26  ;;  %v667_v26 = vld [vmem:[#allocation5 + $0x710] sm:$0xff] }
 0x2d1   :  { %v392_v28 = vpop.xlane.xlu0 %391 }
 0x2d2   :  { %v393_v29 = vsub.f32 %v390_v19, %v392_v28  ;;  %v490_v28 = vld [vmem:[#allocation5 + $0x4b0] sm:$0xff] }
 0x2d3   :  { %528 = vmatpush.msrb.mxu2 %v490_v28 }
 0x2d4   :  { %v394_v30 = vmul.f32 1.442695, %v393_v29  ;;  %v491_v29 = vld [vmem:[#allocation5 + $0x4b8] sm:$0xff] }
 0x2d5   :  { %548 = vmatpush.msrb.mxu3 %v491_v29  ;;  %v650_v29 = vld [vmem:[#allocation5 + $0x600] sm:$0xff] }
 0x2d6   :  { %753 = vpow2.f32 %v394_v30  ;;  %v488_v30 = vld [vmem:[#allocation5 + $0x4a0] sm:$0xff] }
 0x2d7   :  { %529 = vmatpush.msrb.mxu2 %v488_v30  ;;  %v666_v30 = vld [vmem:[#allocation5 + $0x700] sm:$0xff] }
 0x2d9   :  { %530 = vmatpush.msrb.mxu2 %v486_v33  ;;  %v649_v33 = vld [vmem:[#allocation5 + $0x5f0] sm:$0xff] }
 0x2db   :  { %531 = vmatpush.msrb.mxu2 %v484_v36 }
 0x2dc   :  { %v754_v31 = vpop.eup %753 }
 0x2dd   :  { %396 = vadd.xlane.f32.xlu0 %v754_v31 }
 0x350   :  { %v397_v43 = vpop.xlane.xlu0 %396 }
 0x351   :  { %755 = vrcp.f32 %v397_v43  ;;  %v409_v49 = vand.u32 2147483648, %v397_v43  ;;  %v407_v51 = vand.u32 2147483647, %v397_v43  ;;  %vm403_vm1 = vweird.f32 %v397_v43 }
 0x353   :  { %v410_v53 = vor.u32 1.1754944e-38, %v409_v49  ;;  %vm408_vm3 = vcmp.eq.f32.partialorder %v407_v51, 8.507059e+37  ;;  %v449_v49 = vld [vmem:[#allocation7 + $0x6] ss:$0 sm:$0xff] }
 0x357   :  { %v756_v44 = vpop.eup %755 }
 0x358   :  { %v399_v45 = vmul.f32 %v756_v44, %v397_v43  ;;  %vm404_vm15 = vweird.f32 %v756_v44 }
 0x359   :  { %vm405_vm2 = vmor %vm403_vm1, %vm404_vm15 }
 0x35a   :  { %v400_v48 = vsub.f32 1.0, %v399_v45 }
 0x35c   :  { %v401_v50 = vmul.f32 %v756_v44, %v400_v48 }
 0x35e   :  { %v402_v52 = vadd.f32 %v756_v44, %v401_v50 }
 0x360   :  { %v406_v54 = vsel %vm405_vm2, %v756_v44, %v402_v52 }
 0x361   :  { %v411_v55 = vsel %vm408_vm3, %v410_v53, %v406_v54  ;;  %v450_v53 = vld [vmem:[#allocation7 + $0x7] ss:$0 sm:$0xff] }
 0x362   :  { %v412_v56 = vmul.f32 %v754_v31, %v411_v55  ;;  %v489_v31 = vld [vmem:[#allocation5 + $0x4a8] sm:$0xff] }
 0x363   :  { %549 = vmatpush.msrb.mxu3 %v489_v31 }
 0x364   :  { %445 = vmatmul.f32.vlgmr.msrb.gmra.mxu1 %v412_v56 }
 0x365   :  { %550 = vmatpush.msrb.mxu3 %v487_v34  ;;  %v665_v34 = vld [vmem:[#allocation5 + $0x6f0] sm:$0xff] }
 0x367   :  { %551 = vmatpush.msrb.mxu3 %v485_v37  ;;  %v648_v37 = vld [vmem:[#allocation5 + $0x5e0] sm:$0xff] }
 0x3e1   :  { %v940_v59 = vpop.f32.mrf.mxu1 }
 0x3e2   :  { %v451_v60 = vrot.slane %v940_v59, 4 }
 0x3e4   :  { %v452_v63 = vadd.f32 %v451_v60, %v940_v59 }
 0x3e6   :  { %v453_v2 = vrot.slane %v452_v63, 2 }
 0x3e8   :  { %v454_v4 = vadd.f32 %v453_v2, %v452_v63 }
 0x3ea   :  { %v455_v6 = vrot.slane %v454_v4, 1 }
 0x3ec   :  { %v456_v22 = vadd.f32 %v455_v6, %v454_v4  ;;  %v672_v6 = vld [vmem:[#allocation5 + $0x760] sm:$0xff] }
 0x3ed   :  { %696 = vmatpush.msra.mxu1 %v672_v6  ;;  %v557_v6 = vld [vmem:[#allocation7 + $0x10] ss:$8 sm:$0x3] }
 0x3ee   :  { %v457_v10 = vmul.f32 %v456_v22, %v911_v41  ;;  %v655_v22 = vld [vmem:[#allocation5 + $0x650] sm:$0xff] }
 0x3ef   :  { %697 = vmatpush.msra.mxu1 %v671_v8 }
 0x3f0   :  { %v458_v13 = vsub.f32 %v940_v59, %v457_v10 }
 0x3f1   :  { %698 = vmatpush.msra.mxu1 %v670_v12 }
 0x3f2   :  { %v459_v16 = vmul.f32 %v458_v13, %v458_v13 }
 0x3f4   :  { %v460_v19 = vrot.slane %v459_v16, 4 }
 0x3f6   :  { %v461_v24 = vadd.f32 %v460_v19, %v459_v16  ;;  %v669_v16 = vld [vmem:[#allocation5 + $0x730] sm:$0xff]  ;;  %v652_v19 = vld [vmem:[#allocation5 + $0x620] sm:$0xff] }
 0x3f7   :  { %699 = vmatpush.msra.mxu1 %v669_v16 }
 0x3f8   :  { %v462_v27 = vrot.slane %v461_v24, 2 }
 0x3f9   :  { %700 = vmatpush.msra.mxu1 %v668_v20  ;;  %v559_v20 = vld [vmem:[#allocation7 + $0x11] ss:$8 sm:$0x3] }
 0x3fa   :  { %v463_v32 = vadd.f32 %v462_v27, %v461_v24 }
 0x3fb   :  { %701 = vmatpush.msra.mxu1 %v667_v26 }
 0x3fc   :  { %v464_v35 = vrot.slane %v463_v32, 1 }
 0x3fd   :  { %702 = vmatpush.msra.mxu1 %v666_v30 }
 0x3fe   :  { %v465_v38 = vadd.f32 %v464_v35, %v463_v32 }
 0x3ff   :  { %703 = vmatpush.msra.mxu1 %v665_v34 }
 0x400   :  { %v466_v39 = vmul.f32 %v465_v38, %v911_v41  ;;  %v664_v38 = vld [vmem:[#allocation5 + $0x6e0] sm:$0xff] }
 0x401   :  { %704 = vmatpush.msra.mxu1 %v664_v38 }
 0x402   :  { %v467_v40 = vadd.f32 1e-05, %v466_v39 }
 0x404   :  { %757 = vrsqrt.f32 %v467_v40  ;;  %vm474_vm5 = vweird.f32 %v467_v40 }
 0x40a   :  { %v758_v42 = vpop.eup %757 }
 0x40b   :  { %v469_v43 = vmul.f32 %v758_v42, %v467_v40  ;;  %vm475_vm4 = vweird.f32 %v758_v42 }
 0x40c   :  { %vm476_vm6 = vmor %vm474_vm5, %vm475_vm4 }
 0x40d   :  { %v470_v44 = vmul.f32 %v758_v42, %v469_v43  ;;  %v663_v43 = vld [vmem:[#allocation5 + $0x6d0] sm:$0xff] }
 0x40e   :  { %705 = vmatpush.msra.mxu1 %v663_v43 }
 0x40f   :  { %v471_v45 = vmul.f32 0.5, %v470_v44 }
 0x411   :  { %v472_v48 = vsub.f32 1.5, %v471_v45 }
 0x413   :  { %v473_v50 = vmul.f32 %v758_v42, %v472_v48  ;;  %v646_v48 = vld [vmem:[#allocation5 + $0x5c0] sm:$0xff] }
 0x415   :  { %v477_v51 = vsel %vm476_vm6, %v758_v42, %v473_v50  ;;  %v647_v42 = vld [vmem:[#allocation5 + $0x5d0] sm:$0xff] }
 0x416   :  { %v478_v52 = vmul.f32 %v477_v51, %v449_v49  ;;  %v662_v49 = vld [vmem:[#allocation5 + $0x6c0] sm:$0xff] }
 0x417   :  { %706 = vmatpush.msra.mxu1 %v662_v49 }
 0x418   :  { %v479_v54 = vmul.f32 %v478_v52, %v457_v10  ;;  %v481_v55 = vmul.f32 %v478_v52, %v940_v59  ;;  %v657_v59 = vld [vmem:[#allocation5 + $0x670] sm:$0xff] }
 0x419   :  { %675 = vmatpush.msra.mxu0 %v657_v59  ;;  %v645_v52 = vld [vmem:[#allocation5 + $0x5b0] sm:$0xff] }
 0x41a   :  { %v480_v56 = vsub.f32 %v450_v53, %v479_v54  ;;  %v661_v53 = vld [vmem:[#allocation5 + $0x6b0] sm:$0xff] }
 0x41b   :  { %676 = vmatpush.msra.mxu0 %v656_v46  ;;  %707 = vmatpush.msra.mxu1 %v661_v53 }
 0x41c   :  { %v482_v57 = vadd.f32 %v481_v55, %v480_v56  ;;  %v644_v56 = vld [vmem:[#allocation5 + $0x5a0] sm:$0xff] }
 0x41d   :  { %677 = vmatpush.msra.mxu0 %v655_v22 }
 0x41e   :  { %v483_v58 = vmax.f32 %v482_v57, 0.0  ;;  %v660_v57 = vld [vmem:[#allocation5 + $0x6a0] sm:$0xff] }
 0x41f   :  { %678 = vmatpush.msra.mxu0 %v654_v11  ;;  %708 = vmatpush.msra.mxu1 %v660_v57 }
 0x420   :  { %532 = vmatmul.f32.vlgmr.msrb.gmra.mxu2 %v483_v58  ;;  %552 = vmatmul.f32.vlgmr.msrb.gmra.mxu3 %v483_v58 }
 0x421   :  { %679 = vmatpush.msra.mxu0 %v653_v15 }
 0x423   :  { %680 = vmatpush.msra.mxu0 %v652_v19 }
 0x425   :  { %681 = vmatpush.msra.mxu0 %v651_v25 }
 0x427   :  { %682 = vmatpush.msra.mxu0 %v650_v29 }
 0x429   :  { %683 = vmatpush.msra.mxu0 %v649_v33 }
 0x42b   :  { %684 = vmatpush.msra.mxu0 %v648_v37 }
 0x42d   :  { %685 = vmatpush.msra.mxu0 %v647_v42 }
 0x42f   :  { %686 = vmatpush.msra.mxu0 %v646_v48 }
 0x431   :  { %687 = vmatpush.msra.mxu0 %v645_v52 }
 0x433   :  { %688 = vmatpush.msra.mxu0 %v644_v56 }
 0x4a3   :  { %v948_v60 = vpop.f32.mrf.mxu2  ;;  %v950_v61 = vpop.f32.mrf.mxu3 }
 0x4a4   :  { %v560_v62 = vrot.slane %v948_v60, 4  ;;  %v566_v63 = vrot.slane %v950_v61, 4 }
 0x4a6   :  { %v561_v0 = vadd.f32 %v560_v62, %v948_v60  ;;  %v567_v1 = vadd.f32 %v566_v63, %v950_v61  ;;  %v643_v63 = vld [vmem:[#allocation5 + $0x590] sm:$0xff] }
 0x4a7   :  { %689 = vmatpush.msra.mxu0 %v643_v63 }
 0x4a8   :  { %v562_v2 = vrot.slane %v561_v0, 2  ;;  %v568_v47 = vrot.slane %v567_v1, 2 }
 0x4aa   :  { %v563_v4 = vadd.f32 %v562_v2, %v561_v0  ;;  %v569_v5 = vadd.f32 %v568_v47, %v567_v1  ;;  %v659_v0 = vld [vmem:[#allocation5 + $0x690] sm:$0xff]  ;;  %v642_v1 = vld [vmem:[#allocation5 + $0x580] sm:$0xff] }
 0x4ab   :  { %709 = vmatpush.msra.mxu1 %v659_v0  ;;  %v658_v2 = vld [vmem:[#allocation5 + $0x680] sm:$0xff]  ;;  %690 = vmatpush.msra.mxu0 %v642_v1 }
 0x4ac   :  { %v564_v7 = vrot.slane %v563_v4, 1  ;;  %v570_v21 = vrot.slane %v569_v5, 1 }
 0x4ad   :  { %710 = vmatpush.msra.mxu1 %v658_v2 }
 0x4ae   :  { %v565_v9 = vadd.f32 %v564_v7, %v563_v4  ;;  %v571_v10 = vadd.f32 %v570_v21, %v569_v5 }
 0x4b0   :  { %v957_v13 = vmul.f32 %v565_v9, %v911_v41  ;;  %v960_v14 = vmul.f32 %v571_v10, %v911_v41  ;;  %v615_v9 = vperm.slane %v557_v6, 0  ;;  %v616_v10 = vperm.slane %v557_v6, 1 }
 0x4b2   :  { %v574_v17 = vsub.f32 %v948_v60, %v957_v13  ;;  %v575_v18 = vsub.f32 %v950_v61, %v960_v14 }
 0x4b4   :  { %v576_v23 = vmul.f32 %v574_v17, %v574_v17  ;;  %v577_v24 = vmul.f32 %v575_v18, %v575_v18 }
 0x4b6   :  { %v578_v27 = vrot.slane %v576_v23, 4  ;;  %v584_v28 = vrot.slane %v577_v24, 4 }
 0x4b8   :  { %v579_v31 = vadd.f32 %v578_v27, %v576_v23  ;;  %v585_v32 = vadd.f32 %v584_v28, %v577_v24 }
 0x4ba   :  { %v580_v35 = vrot.slane %v579_v31, 2  ;;  %v586_v36 = vrot.slane %v585_v32, 2 }
 0x4bc   :  { %v581_v39 = vadd.f32 %v580_v35, %v579_v31  ;;  %v587_v40 = vadd.f32 %v586_v36, %v585_v32 }
 0x4be   :  { %v582_v44 = vrot.slane %v581_v39, 1  ;;  %v588_v45 = vrot.slane %v587_v40, 1 }
 0x4c0   :  { %v583_v50 = vadd.f32 %v582_v44, %v581_v39  ;;  %v589_v51 = vadd.f32 %v588_v45, %v587_v40 }
 0x4c2   :  { %v590_v54 = vmul.f32 %v583_v50, %v911_v41  ;;  %v591_v55 = vmul.f32 %v589_v51, %v911_v41 }
 0x4c4   :  { %v592_v58 = vadd.f32 1e-05, %v590_v54  ;;  %v593_v62 = vadd.f32 1e-05, %v591_v55 }
 0x4c6   :  { %759 = vrsqrt.f32 %v592_v58  ;;  %vm600_vm10 = vweird.f32 %v592_v58  ;;  %vm610_vm12 = vweird.f32 %v593_v62 }
 0x4c7   :  { %761 = vrsqrt.f32 %v593_v62 }
 0x4cc   :  { %v760_v47 = vpop.eup %759 }
 0x4cd   :  { %v762_v59 = vpop.eup %761  ;;  %v595_v3 = vmul.f32 %v760_v47, %v592_v58  ;;  %vm601_vm7 = vweird.f32 %v760_v47 }
 0x4ce   :  { %v605_v41 = vmul.f32 %v762_v59, %v593_v62  ;;  %vm611_vm9 = vweird.f32 %v762_v59  ;;  %vm602_vm11 = vmor %vm600_vm10, %vm601_vm7 }
 0x4cf   :  { %v596_v4 = vmul.f32 %v760_v47, %v595_v3  ;;  %vm612_vm13 = vmor %vm610_vm12, %vm611_vm9 }
 0x4d0   :  { %v606_v5 = vmul.f32 %v762_v59, %v605_v41 }
 0x4d1   :  { %v597_v46 = vmul.f32 0.5, %v596_v4 }
 0x4d2   :  { %v607_v7 = vmul.f32 0.5, %v606_v5 }
 0x4d3   :  { %v598_v21 = vsub.f32 1.5, %v597_v46 }
 0x4d4   :  { %v608_v22 = vsub.f32 1.5, %v607_v7 }
 0x4d5   :  { %v599_v8 = vmul.f32 %v760_v47, %v598_v21 }
 0x4d6   :  { %v609_v11 = vmul.f32 %v762_v59, %v608_v22 }
 0x4d7   :  { %v603_v12 = vsel %vm602_vm11, %v760_v47, %v599_v8 }
 0x4d8   :  { %v613_v15 = vsel %vm612_vm13, %v762_v59, %v609_v11  ;;  %v619_v16 = vmul.f32 %v615_v9, %v603_v12 }
 0x4d9   :  { %v620_v17 = vmul.f32 %v616_v10, %v613_v15 }
 0x4da   :  { %v621_v19 = vmul.f32 %v619_v16, %v957_v13  ;;  %v629_v24 = vperm.slane %v619_v16, 0  ;;  %v674_v13 = vld [vmem:[#allocation7 + $0x12] ss:$0 sm:$0xff] }
 0x4db   :  { %v622_v18 = vmul.f32 %v620_v17, %v960_v14  ;;  %v630_v25 = vperm.slane %v620_v17, 0 }
 0x4dc   :  { %v631_v28 = vmul.f32 %v629_v24, %v948_v60 }
 0x4dd   :  { %v625_v23 = vrot.slane %v622_v18, 7  ;;  %v632_v29 = vmul.f32 %v630_v25, %v950_v61 }
 0x4df   :  { %v626_v26 = vsel %vm197_vm8, %v621_v19, %v625_v23 }
 0x4e0   :  { %v628_v27 = vsub.f32 %v559_v20, %v626_v26 }
 0x4e2   :  { %v635_v30 = vperm.slane %v628_v27, 1  ;;  %v634_v31 = vperm.slane %v628_v27, 0 }
 0x4e4   :  { %v639_v32 = vadd.f32 %v635_v30, %v632_v29  ;;  %v638_v33 = vadd.f32 %v634_v31, %v631_v28 }
 0x4e6   :  { %v641_v34 = vmax.f32 %v639_v32, 0.0  ;;  %v640_v35 = vmax.f32 %v638_v33, 0.0 }
 0x4e8   :  { %691 = vmatmul.f32.vlgmr.msra.gmra.mxu0 %v640_v35  ;;  %711 = vmatmul.f32.vlgmr.msra.gmra.mxu1 %v641_v34 }
 0x565   :  { %v692_v14 = vpop.f32.mrf.mxu0  ;;  %v712_v60 = vpop.f32.mrf.mxu1 }
 0x566   :  { %v693_v36 = vadd.f32 %v692_v14, %v674_v13 }
 0x568   :  { %v713_v37 = vadd.f32 %v712_v60, %v693_v36 }
 0x56a   :  { %715 = vst.msk [vmem:[#allocation8] sm:$0xff] %vm77_vm0, %v713_v37 }
 0x56b   :  { %726 = dma.vmem_to_hbm [thread:$0]  %s722_s2, 128, %s724_s30, [#allocation4]  }
 0x56c   :  { %863 = dma.done.wait [#allocation4], 128  }
 0x56d   :  { %864 = vsyncadd [#allocation4], 4294967168 }
 0x56e   :  { %731 = vsyncpa [#allocation3], 1 }
 0x56f   :  { %732 = vsyncpa [#allocation6], 1 }
 0x570   :  { %733 = vsyncpa [#allocation4], 1 }

</bundles_post_ra>
